<compile_context>
chip_gen: v7x
topology: tpu7x:2x2x1
jax: 0.10.0
libtpu: 0.0.40
codegen_flags: <defaults>
</compile_context>

<pallas_src>
import jax
import jax.numpy as jnp
from jax.experimental import pallas as pl
from jax.experimental.pallas import tpu as pltpu

N_INPUTS = 7
N_NODES = 20
LN_EPS = 1e-5  # torch.layer_norm default


# ---------------------------------------------------------------------------
# Kernel
# ---------------------------------------------------------------------------
def mlp_kernel(x_ref, w0_ref, w1_ref, b1_ref, w2_ref, b2_ref, o_ref):
    # x tile is (8, TB): rows 0..6 = features, row 7 = 1.0 (folds in b0).
    x = x_ref[...]

    # (1, 20) constant row of 1/20: turns a sublane reduce into an MXU dot.
    inv_n_row = jnp.full((1, N_NODES), 1.0 / N_NODES, dtype=jnp.float32)

    def layer_norm_sin(y):
        # LayerNorm over the 20-feature (sublane) axis of a (20, TB) tile.
        # Mean and variance as MXU matmuls (MXU is ~idle; the XLU reduce
        # trees + broadcasts were the saturating vector-side work).
        mean = jnp.dot(inv_n_row, y, preferred_element_type=jnp.float32)      # (1, TB)
        c = y - mean                                                          # (20, TB)
        var = jnp.dot(inv_n_row, c * c, preferred_element_type=jnp.float32)   # (1, TB)
        # TODO(synk): bf16 sin on v6e/v7x would roughly halve VALU cost but
        # misses the 1e-4 accuracy target; kept in f32.
        return jnp.sin(c * jax.lax.rsqrt(var + LN_EPS))

    # layer0: Linear(7 -> 20) with bias folded in (w0_ref is (20, 8)).
    y = jnp.dot(w0_ref[...], x, preferred_element_type=jnp.float32)           # (20, TB)
    y = layer_norm_sin(y)

    # layer1: Linear(20 -> 20) + bias column.
    y = jnp.dot(w1_ref[...], y, preferred_element_type=jnp.float32) + b1_ref[...]
    y = layer_norm_sin(y)

    # layer2: Linear(20 -> 1) on the MXU -> lane-dense (1, TB) store.
    out = jnp.dot(w2_ref[...], y, preferred_element_type=jnp.float32) + b2_ref[...]
    o_ref[...] = out.astype(o_ref.dtype)


# ---------------------------------------------------------------------------
# Wrapper
# ---------------------------------------------------------------------------
def mlp_forward(x, params, tb=16384):
    """x: (B, n_inputs) f32. params in torch layout: w (out, in), b (out,)."""
    w0, b0, w1, b1, w2, b2 = params
    B = x.shape[0]

    # Lane-dense batch tile: multiple of 128, default 16384 (per-step overhead
    # amortization), capped at the lane-aligned batch size.
    tb = max(128, (tb // 128) * 128)
    Bp = ((B + 127) // 128) * 128          # lane alignment only, NOT a TB multiple
    TB = min(tb, Bp)
    grid = (pl.cdiv(Bp, TB),)              # ragged last block handled by Pallas

    # Batch on lanes; append a ones row so layer0's bias rides the matmul
    # (the (7, B) tile pads to 8 sublanes anyway, so this is free in VMEM).
    xt = jnp.transpose(x.astype(jnp.float32))                                # (7, B)
    x_aug = jnp.concatenate([xt, jnp.ones((1, B), jnp.float32)], axis=0)     # (8, B)
    if Bp != B:
        x_aug = jnp.pad(x_aug, ((0, 0), (0, Bp - B)))                        # (8, Bp)

    w0_aug = jnp.concatenate(
        [w0.astype(jnp.float32), b0.reshape(N_NODES, 1).astype(jnp.float32)],
        axis=1)                                                              # (20, 8)
    b1c = b1.reshape(N_NODES, 1).astype(jnp.float32)                         # (20, 1)
    w2r = w2.reshape(1, N_NODES).astype(jnp.float32)                         # (1, 20)
    b2c = b2.reshape(1, 1).astype(jnp.float32)                               # (1, 1)

    out = pl.pallas_call(
        mlp_kernel,
        out_shape=jax.ShapeDtypeStruct((1, Bp), jnp.float32),
        grid=grid,
        in_specs=[
            # x: tiled along the batch (lane) axis.
            pl.BlockSpec((N_INPUTS + 1, TB), lambda i: (0, i)),
            # Weights / biases: constant index maps -> VMEM-resident.
            pl.BlockSpec((N_NODES, N_INPUTS + 1), lambda i: (0, 0)),
            pl.BlockSpec((N_NODES, N_NODES), lambda i: (0, 0)),
            pl.BlockSpec((N_NODES, 1), lambda i: (0, 0)),
            pl.BlockSpec((1, N_NODES), lambda i: (0, 0)),
            pl.BlockSpec((1, 1), lambda i: (0, 0)),
        ],
        out_specs=pl.BlockSpec((1, TB), lambda i: (0, i)),
        compiler_params=pltpu.CompilerParams(
            dimension_semantics=("parallel",),       # megacore sharding on v7x
            vmem_limit_bytes=48 * 1024 * 1024,       # headroom for TB=16K on v5e
        ),
    )(x_aug, w0_aug, w1.astype(jnp.float32), b1c, w2r, b2c)

    # Strip lane padding and restore (B, 1).
    return out[0, :B].reshape(B, 1)


# ---------------------------------------------------------------------------
# Params (torch nn.Linear layout + init) and pure-JAX reference
# ---------------------------------------------------------------------------
def init_params(key):
    """nn.Linear-style init: U(-1/sqrt(fan_in), 1/sqrt(fan_in)); w (out, in), b (out,)."""
    def linear(key, fan_in, fan_out):
        kw, kb = jax.random.split(key)
        bound = 1.0 / jnp.sqrt(float(fan_in))
        w = jax.random.uniform(kw, (fan_out, fan_in), jnp.float32, -bound, bound)
        b = jax.random.uniform(kb, (fan_out,), jnp.float32, -bound, bound)
        return w, b

    k0, k1, k2 = jax.random.split(key, 3)
    w0, b0 = linear(k0, N_INPUTS, N_NODES)
    w1, b1 = linear(k1, N_NODES, N_NODES)
    w2, b2 = linear(k2, N_NODES, 1)
    return (w0, b0, w1, b1, w2, b2)


def _layer_norm_ref(y):
    mean = jnp.mean(y, axis=-1, keepdims=True)
    centered = y - mean
    var = jnp.mean(centered * centered, axis=-1, keepdims=True)
    return centered * jax.lax.rsqrt(var + LN_EPS)


def reference_forward(x, params):
    w0, b0, w1, b1, w2, b2 = params
    y = x @ w0.T + b0
    y = jnp.sin(_layer_norm_ref(y))
    y = y @ w1.T + b1
    y = jnp.sin(_layer_norm_ref(y))
    return y @ w2.T + b2


# ---------------------------------------------------------------------------
if __name__ == "__main__":
    key = jax.random.PRNGKey(0)
    k_x, k_x2, k_p = jax.random.split(key, 3)
    params = init_params(k_p)

    # Small-shape check (B=8 -> single 128-wide lane-padded tile, grid=(1,)).
    B = 8
    x = jax.random.normal(k_x, (B, N_INPUTS), jnp.float32)
    out = jax.block_until_ready(mlp_forward(x, params))
    ref = reference_forward(x, params)
    assert out.shape == (B, 1), out.shape
    assert jnp.allclose(out, ref, atol=1e-4, rtol=1e-4), (out, ref)

    # Multi-tile + ragged-last-block check: B=300 -> Bp=384, TB=256, grid=(2,)
    # (last block masks its out-of-bounds columns).
    B2 = 300
    x2 = jax.random.normal(k_x2, (B2, N_INPUTS), jnp.float32)
    out2 = jax.block_until_ready(mlp_forward(x2, params, tb=256))
    ref2 = reference_forward(x2, params)
    assert out2.shape == (B2, 1), out2.shape
    assert jnp.allclose(out2, ref2, atol=1e-4, rtol=1e-4), (out2, ref2)

    print("KERNEL_OK")
</pallas_src>

<mosaic_0001>
module attributes {stable_mosaic.version = 11 : i64} {
  func.func @mlp_kernel(%arg0: i32, %arg1: memref<8x128xf32, #tpu.memory_space<vmem>>, %arg2: memref<20x8xf32, #tpu.memory_space<vmem>>, %arg3: memref<20x20xf32, #tpu.memory_space<vmem>>, %arg4: memref<20x1xf32, #tpu.memory_space<vmem>>, %arg5: memref<1x20xf32, #tpu.memory_space<vmem>>, %arg6: memref<1x1xf32, #tpu.memory_space<vmem>>, %arg7: memref<1x128xf32, #tpu.memory_space<vmem>>) attributes {dimension_semantics = [#tpu.dimension_semantics<parallel>], iteration_bounds = array<i64: 1>, scalar_prefetch = 0 : i64, scratch_operands = 0 : i64, tpu.core_type = #tpu.core_type<tc>, window_params = [{transform_indices = @transform_0, window_bounds = array<i64: 8, 128>}, {pipeline_mode = #tpu.pipeline_mode<synchronous>, transform_indices = @transform_1, window_bounds = array<i64: 20, 8>}, {pipeline_mode = #tpu.pipeline_mode<synchronous>, transform_indices = @transform_2, window_bounds = array<i64: 20, 20>}, {pipeline_mode = #tpu.pipeline_mode<synchronous>, transform_indices = @transform_3, window_bounds = array<i64: 20, 1>}, {pipeline_mode = #tpu.pipeline_mode<synchronous>, transform_indices = @transform_4, window_bounds = array<i64: 1, 20>}, {pipeline_mode = #tpu.pipeline_mode<synchronous>, transform_indices = @transform_5, window_bounds = array<i64: 1, 1>}, {transform_indices = @transform_6, window_bounds = array<i64: 1, 128>}]} {
    %c0 = arith.constant 0 : index
    %c0_0 = arith.constant 0 : index
    %0 = vector.load %arg1[%c0, %c0_0] : memref<8x128xf32, #tpu.memory_space<vmem>>, vector<8x128xf32>
    %cst = arith.constant 5.000000e-02 : f32
    %1 = vector.broadcast %cst : f32 to vector<1x20xf32>
    %c0_1 = arith.constant 0 : index
    %c0_2 = arith.constant 0 : index
    %2 = vector.load %arg2[%c0_1, %c0_2] : memref<20x8xf32, #tpu.memory_space<vmem>>, vector<20x8xf32>
    %cst_3 = arith.constant dense<0.000000e+00> : vector<20x128xf32>
    %3 = tpu.matmul %2, %0, %cst_3 {dimension_numbers = #tpu.dot_dimension_numbers<[1], [0], [0], [1], [0, 0, 1, 1], [], []>} : vector<20x8xf32>, vector<8x128xf32>, vector<20x128xf32> -> vector<20x128xf32>
    %cst_4 = arith.constant dense<0.000000e+00> : vector<1x128xf32>
    %4 = tpu.matmul %1, %3, %cst_4 {dimension_numbers = #tpu.dot_dimension_numbers<[1], [0], [0], [1], [0, 0, 1, 1], [], []>} : vector<1x20xf32>, vector<20x128xf32>, vector<1x128xf32> -> vector<1x128xf32>
    %5 = vector.broadcast %4 : vector<1x128xf32> to vector<20x128xf32>
    %6 = arith.subf %3, %5 : vector<20x128xf32>
    %7 = arith.mulf %6, %6 : vector<20x128xf32>
    %cst_5 = arith.constant dense<0.000000e+00> : vector<1x128xf32>
    %8 = tpu.matmul %1, %7, %cst_5 {dimension_numbers = #tpu.dot_dimension_numbers<[1], [0], [0], [1], [0, 0, 1, 1], [], []>} : vector<1x20xf32>, vector<20x128xf32>, vector<1x128xf32> -> vector<1x128xf32>
    %cst_6 = arith.constant 9.99999974E-6 : f32
    %9 = vector.broadcast %cst_6 : f32 to vector<1x128xf32>
    %10 = arith.addf %8, %9 : vector<1x128xf32>
    %11 = math.rsqrt %10 : vector<1x128xf32>
    %12 = vector.broadcast %11 : vector<1x128xf32> to vector<20x128xf32>
    %13 = arith.mulf %6, %12 : vector<20x128xf32>
    %14 = math.sin %13 : vector<20x128xf32>
    %c0_7 = arith.constant 0 : index
    %c0_8 = arith.constant 0 : index
    %15 = vector.load %arg3[%c0_7, %c0_8] : memref<20x20xf32, #tpu.memory_space<vmem>>, vector<20x20xf32>
    %cst_9 = arith.constant dense<0.000000e+00> : vector<20x128xf32>
    %16 = tpu.matmul %15, %14, %cst_9 {dimension_numbers = #tpu.dot_dimension_numbers<[1], [0], [0], [1], [0, 0, 1, 1], [], []>} : vector<20x20xf32>, vector<20x128xf32>, vector<20x128xf32> -> vector<20x128xf32>
    %c0_10 = arith.constant 0 : index
    %c0_11 = arith.constant 0 : index
    %17 = vector.load %arg4[%c0_10, %c0_11] : memref<20x1xf32, #tpu.memory_space<vmem>>, vector<20x1xf32>
    %18 = vector.broadcast %17 : vector<20x1xf32> to vector<20x128xf32>
    %19 = arith.addf %16, %18 : vector<20x128xf32>
    %cst_12 = arith.constant dense<0.000000e+00> : vector<1x128xf32>
    %20 = tpu.matmul %1, %19, %cst_12 {dimension_numbers = #tpu.dot_dimension_numbers<[1], [0], [0], [1], [0, 0, 1, 1], [], []>} : vector<1x20xf32>, vector<20x128xf32>, vector<1x128xf32> -> vector<1x128xf32>
    %21 = vector.broadcast %20 : vector<1x128xf32> to vector<20x128xf32>
    %22 = arith.subf %19, %21 : vector<20x128xf32>
    %23 = arith.mulf %22, %22 : vector<20x128xf32>
    %cst_13 = arith.constant dense<0.000000e+00> : vector<1x128xf32>
    %24 = tpu.matmul %1, %23, %cst_13 {dimension_numbers = #tpu.dot_dimension_numbers<[1], [0], [0], [1], [0, 0, 1, 1], [], []>} : vector<1x20xf32>, vector<20x128xf32>, vector<1x128xf32> -> vector<1x128xf32>
    %cst_14 = arith.constant 9.99999974E-6 : f32
    %25 = vector.broadcast %cst_14 : f32 to vector<1x128xf32>
    %26 = arith.addf %24, %25 : vector<1x128xf32>
    %27 = math.rsqrt %26 : vector<1x128xf32>
    %28 = vector.broadcast %27 : vector<1x128xf32> to vector<20x128xf32>
    %29 = arith.mulf %22, %28 : vector<20x128xf32>
    %30 = math.sin %29 : vector<20x128xf32>
    %c0_15 = arith.constant 0 : index
    %c0_16 = arith.constant 0 : index
    %31 = vector.load %arg5[%c0_15, %c0_16] : memref<1x20xf32, #tpu.memory_space<vmem>>, vector<1x20xf32>
    %cst_17 = arith.constant dense<0.000000e+00> : vector<1x128xf32>
    %32 = tpu.matmul %31, %30, %cst_17 {dimension_numbers = #tpu.dot_dimension_numbers<[1], [0], [0], [1], [0, 0, 1, 1], [], []>} : vector<1x20xf32>, vector<20x128xf32>, vector<1x128xf32> -> vector<1x128xf32>
    %c0_18 = arith.constant 0 : index
    %c0_19 = arith.constant 0 : index
    %33 = vector.load %arg6[%c0_18, %c0_19] : memref<1x1xf32, #tpu.memory_space<vmem>>, vector<1x1xf32>
    %34 = vector.broadcast %33 : vector<1x1xf32> to vector<1x128xf32>
    %35 = arith.addf %32, %34 : vector<1x128xf32>
    %c0_20 = arith.constant 0 : index
    %c0_21 = arith.constant 0 : index
    %36 = vector.load %arg7[%c0_20, %c0_21] : memref<1x128xf32, #tpu.memory_space<vmem>>, vector<1x128xf32>
    tpu.vector_store %arg7[%c0_20, %c0_21], %35 {strides = array<i32>} : memref<1x128xf32, #tpu.memory_space<vmem>>, vector<1x128xf32>,
    return
  }
  func.func @transform_0(%arg0: i32) -> (i32, i32) {
    %c0_i32 = arith.constant 0 : i32
    %c0_i32_0 = arith.constant 0 : i32
    return %c0_i32, %arg0 : i32, i32
  }
  func.func @transform_1(%arg0: i32) -> (i32, i32) {
    %c0_i32 = arith.constant 0 : i32
    %c0_i32_0 = arith.constant 0 : i32
    %c0_i32_1 = arith.constant 0 : i32
    return %c0_i32, %c0_i32_0 : i32, i32
  }
  func.func @transform_2(%arg0: i32) -> (i32, i32) {
    %c0_i32 = arith.constant 0 : i32
    %c0_i32_0 = arith.constant 0 : i32
    %c0_i32_1 = arith.constant 0 : i32
    return %c0_i32, %c0_i32_0 : i32, i32
  }
  func.func @transform_3(%arg0: i32) -> (i32, i32) {
    %c0_i32 = arith.constant 0 : i32
    %c0_i32_0 = arith.constant 0 : i32
    %c0_i32_1 = arith.constant 0 : i32
    return %c0_i32, %c0_i32_0 : i32, i32
  }
  func.func @transform_4(%arg0: i32) -> (i32, i32) {
    %c0_i32 = arith.constant 0 : i32
    %c0_i32_0 = arith.constant 0 : i32
    %c0_i32_1 = arith.constant 0 : i32
    return %c0_i32, %c0_i32_0 : i32, i32
  }
  func.func @transform_5(%arg0: i32) -> (i32, i32) {
    %c0_i32 = arith.constant 0 : i32
    %c0_i32_0 = arith.constant 0 : i32
    %c0_i32_1 = arith.constant 0 : i32
    return %c0_i32, %c0_i32_0 : i32, i32
  }
  func.func @transform_6(%arg0: i32) -> (i32, i32) {
    %c0_i32 = arith.constant 0 : i32
    %c0_i32_0 = arith.constant 0 : i32
    return %c0_i32, %arg0 : i32, i32
  }
}

</mosaic_0001>

<bundles_post_ra>
// kernel: tpu_custom_call.1
= control target key start
LH: loop header
LB: loop body
LE: loop exit
PB: predicated region body
PF: predicated region fallthrough
CT: control target
= control target key end

     0   :  { %s2077_s0 = inlined_call_operand.vmem [shape: f32[8,128], index: 0, kind: input, shape index: {}]   ;;  %s2078_s1 = inlined_call_operand.vmem [shape: f32[20,8], index: 1, kind: input, shape index: {}]   ;;  %s2079_s2 = inlined_call_operand.vmem [shape: f32[20,20], index: 2, kind: input, shape index: {}]   ;;  %s2080_s3 = inlined_call_operand.vmem [shape: f32[20,1], index: 3, kind: input, shape index: {}]   ;;  %s2081_s4 = inlined_call_operand.vmem [shape: f32[1,20], index: 4, kind: input, shape index: {}]   ;;  %s2082_s5 = inlined_call_operand.<no memory space> [shape: f32[1,1], index: 5, kind: input, shape index: {}]   ;;  %s2083_s6 = inlined_call_operand.hbm [shape: f32[1,128], index: 6, kind: output, shape index: {}]  }
   0x1   :  { %v11_v0 = vstv %s2082_s5 }
   0x2   :  { %12 = vst [vmem:[#allocation2] sm:$0x1] %v11_v0 }
   0x3   :  { %v26_v1 = vld [vmem:[%s2077_s0] sm:$0xff]  ;;  %vm30_vm0 = vcmask 64512   ;;  %v1542_v3 = vmov 0.0   ;;  %vm1543_vm1 = vmmov 0  }
   0x4   :  { %v27_v2 = vld [vmem:[%s2078_s1] sm:$0xff]  ;;  %1363 = vmatprep.subr.mxu0 %v1542_v3  ;;  %1365 = vmatprep.mubr.msk.f32.mxu0 %vm1543_vm1, %v1542_v3 }
   0x5   :  { %13 = vsyncpa [#allocation4], 0  ;;  %1364 = vmatpush3.msra.mxu0 %v26_v1  ;;  %1380 = vmatprep.mubr.msk.f32.mxu1 %vm1543_vm1, %v1542_v3  ;;  %v28_v4 = vld [vmem:[%s2078_s1 + $0x8] sm:$0xff]  ;;  %v29_v5 = vld [vmem:[%s2078_s1 + $0x10] sm:$0xf]  ;;  %v1544_v6 = vmov 0.0|0.0   ;;  %v198_v15 = vlaneseq }
   0x6   :  { %1366 = vmatmul.mubr.msk.f32.vlgmr.msra.gmra.mrb[0].mxu0 %vm30_vm0, %v27_v2  ;;  %1434 = vmatprep.subr.bf16.mxu1 %v1544_v6  ;;  %vm124_vm2 = vcmask 1043456   ;;  %vm120_vm3 = vcmask 162816   ;;  %v1545_v14 = vmov 0.05   ;;  %v604_v31 = vld [vmem:[%s2080_s3] sm:$0xff]  ;;  %v1546_v33 = vmov 0  }
   0x7   :  { %1368 = vmatprep.mubr.msk.f32.mxu0 %vm1543_vm1, %v1542_v3  ;;  %1440 = vmatprep.subr.bf16.mxu0 %v1544_v6  ;;  %v199_v16 = vshrl.u32 %v198_v15, 7  ;;  %v606_v32 = vld [vmem:[%s2080_s3 + $0x10] sm:$0xf]  ;;  %v605_v35 = vld [vmem:[%s2080_s3 + $0x8] sm:$0xff]  ;;  %s1553_s16 = smov [#allocation3]  }
   0x8   :  { %1488 = vset.pattern.permute.xlu0 %v1546_v33  ;;  %1489 = vset.pattern.permute.xlu1 %v1546_v33  ;;  %s1284_s17 = sshll.u32 %s1553_s16, 4  ;;  %s1285_s17 = int_to_ptr.vmem [resolvable:$true] %s1284_s17 }
   0x9   :  { %v1624_v17 = vsub.s32 0, %v199_v16  ;;  %609 = vperm.xlu0 %1488, %v604_v31   ;;  %619 = vperm.xlu1 %1489, %v606_v32   ;;  %v1191_v36 = vld [vmem:[#allocation2] sm:$0x1]  ;;  %v1550_v16 = vmov 2102212464   ;;  %s1518_s18 = scalar_lea.vmem %s1285_s17, 16  ;;  %p1523_p1 = scmp.lt.s32.totalorder %s1285_s17, %s1285_s17 }
   0xa   :  { %1369 = vmatmul.mubr.msk.f32.gmra.mrb[2].mxu0 %vm30_vm0, %v28_v4  ;;  %p1519_p0 = scmp.ne.s32.totalorder %s1285_s17, %s1518_s18  ;;  %s1522_s19 = scalar_lea.vmem %s1285_s17, 32 }
   0xb   :  { %1371 = vmatprep.mubr.msk.f32.mxu0 %vm1543_vm1, %v1542_v3  ;;  %p1524_p2 = scmp.lt.s32.totalorder %s1522_s19, %s1518_s18 }
   0xd   :  { %614 = vperm.xlu0 %1488, %v605_v35   ;;  %1194 = vperm.xlu1 %1489, %v1191_v36   ;;  %p1525_p3 = por %p1524_p2, %p1523_p1 }
   0xe   :  { %1372 = vmatmul.mubr.msk.f32.gmra.mrb[4].mxu0 %vm30_vm0, %v29_v5 }
   0xf   :  { %1398 = vmatprep.mubr.msk.f32.mxu0 %vm1543_vm1, %v1542_v3  ;;  %p1526_p4 = pnand %p1525_p3, %p1519_p0 }
  0xd9   :  { %v106_v7 = vpop.f32.mrb[0].mxu0 }
  0xda   :  { %v1367_v8 = vpop.f32.mrb[1].mxu0 }
  0xdd   :  { %v111_v9 = vpop.f32.mrb[2].mxu0 }
  0xde   :  { %v1370_v10 = vpop.f32.mrb[3].mxu0  ;;  %v1435_v11 = vpack.c.bf16 %v111_v9, %v106_v7 }
  0xe0   :  { %1436 = vmatpush3.bf16.msra.mxu1 %v1435_v11  ;;  %v1548_v11 = vmov 2475754826  }
  0xe1   :  { %v116_v12 = vpop.f32.mrb[4].mxu0  ;;  %1378 = vmatprep.subr.mxu1 %v1542_v3 }
  0xe2   :  { %v1373_v13 = vpop.f32.mrb[5].mxu0 }
  0xe3   :  { %v1549_v13 = vmov 2131351028  }
  0xe4   :  { %1379 = vmatpush3.msk.msra.mxu1 %vm124_vm2, %v116_v12 }
  0xe5   :  { %1381 = vmatmul.mubr.msk.f32.vlgmr.msra.gmra.mrb[0].mxu1 %vm120_vm3, %v1545_v14  ;;  %1437 = vmatprep.subr.bf16.mxu1 %v1544_v6 }
  0xe6   :  { %1389 = vmatprep.mubr.msk.f32.mxu1 %vm1543_vm1, %v1542_v3 }
 0x1b8   :  { %v194_v18 = vpop.f32.mrb[0].mxu1 }
 0x1b9   :  { %v201_v19 = vrot.slane %v194_v18, %v1624_v17  ;;  %v1382_v20 = vpop.f32.mrb[1].mxu1 }
 0x1bb   :  { %v202_v21 = vsub.f32 %v106_v7, %v201_v19  ;;  %v203_v22 = vsub.f32 %v111_v9, %v201_v19  ;;  %v204_v23 = vsub.f32 %v116_v12, %v201_v19  ;;  %v1547_v9 = vmov 683565275  }
 0x1bc   :  { %v1551_v19 = vmov 920167782  }
 0x1bd   :  { %v205_v24 = vmul.f32 %v202_v21, %v202_v21  ;;  %v206_v25 = vmul.f32 %v203_v22, %v203_v22  ;;  %v207_v27 = vmul.f32 %v204_v23, %v204_v23 }
 0x1bf   :  { %v1438_v26 = vpack.c.bf16 %v206_v25, %v205_v24 }
 0x1c1   :  { %1439 = vmatpush3.bf16.msra.mxu1 %v1438_v26  ;;  %v1552_v26 = vmov 1326507024  }
 0x1c2   :  { %1387 = vmatprep.subr.mxu1 %v1542_v3 }
 0x1c5   :  { %1388 = vmatpush3.msk.msra.mxu1 %vm124_vm2, %v207_v27 }
 0x1c6   :  { %1390 = vmatmul.mubr.msk.f32.vlgmr.msra.gmra.mrb[2].mxu1 %vm120_vm3, %v1545_v14  ;;  %1443 = vmatprep.subr.bf16.mxu1 %v1544_v6 }
 0x1c7   :  { %1413 = vmatprep.mubr.msk.f32.mxu1 %vm1543_vm1, %v1542_v3 }
 0x299   :  { %v277_v28 = vpop.f32.mrb[2].mxu1 }
 0x29a   :  { %v278_v29 = vadd.f32 1e-05, %v277_v28  ;;  %v1391_v30 = vpop.f32.mrb[3].mxu1 }
 0x29c   :  { %1490 = vrsqrt.f32 %v278_v29 }
 0x2a6   :  { %v1491_v34 = vpop.eup %1490 }
 0x2a7   :  { %v285_v37 = vrot.slane %v1491_v34, %v1624_v17 }
 0x2a9   :  { %v1644_v38 = vmul.f32 %v285_v37, %v202_v21  ;;  %v1646_v39 = vmul.f32 %v285_v37, %v203_v22  ;;  %v1648_v40 = vmul.f32 %v285_v37, %v204_v23 }
 0x2ab   :  { %v292_v41 = vand.u32 2139095040, %v1644_v38  ;;  %v396_v42 = vand.u32 2139095040, %v1646_v39  ;;  %v500_v43 = vand.u32 2139095040, %v1648_v40  ;;  %v289_v44 = vand.u32 2147483647, %v1644_v38 }
 0x2ac   :  { %v393_v45 = vand.u32 2147483647, %v1646_v39 }
 0x2ad   :  { %v293_v46 = vshrl.u32 %v292_v41, 23  ;;  %v397_v47 = vshrl.u32 %v396_v42, 23  ;;  %v501_v48 = vshrl.u32 %v500_v43, 23  ;;  %v296_v49 = vand.u32 8388607, %v289_v44 }
 0x2ae   :  { %v400_v50 = vand.u32 8388607, %v393_v45 }
 0x2af   :  { %v1299_v51 = vadd.s32 4294967169, %v293_v46  ;;  %v1303_v52 = vadd.s32 4294967169, %v397_v47  ;;  %v1307_v53 = vadd.s32 4294967169, %v501_v48  ;;  %v297_v57 = vor.u32 8388608, %v296_v49 }
 0x2b0   :  { %v401_v58 = vor.u32 8388608, %v400_v50 }
 0x2b1   :  { %v299_v54 = vadd.s32 1, %v1299_v51  ;;  %v403_v55 = vadd.s32 1, %v1303_v52  ;;  %v507_v56 = vadd.s32 1, %v1307_v53  ;;  %v1663_v2 = vshll.u32 %v297_v57, 8 }
 0x2b2   :  { %v1665_v4 = vshll.u32 %v401_v58, 8 }
 0x2b3   :  { %vm300_vm4 = vcmp.gt.s32.totalorder %v299_v54, 0  ;;  %vm404_vm5 = vcmp.gt.s32.totalorder %v403_v55, 0  ;;  %vm508_vm6 = vcmp.gt.s32.totalorder %v507_v56, 0 }
 0x2b4   :  { %v301_v59 = vsel %vm300_vm4, %v299_v54, 0  ;;  %v405_v60 = vsel %vm404_vm5, %v403_v55, 0  ;;  %v1659_v61 = vsel %vm508_vm6, %v507_v56, 0 }
 0x2b5   :  { %v302_v62 = vshrl.u32 %v301_v59, 5  ;;  %v303_v63 = vand.u32 31, %v301_v59  ;;  %v407_v0 = vand.u32 31, %v405_v60  ;;  %v1661_v1 = vshrl.u32 %v405_v60, 5 }
 0x2b6   :  { %v1668_v8 = vand.u32 31, %v1659_v61 }
 0x2b7   :  { %v304_v5 = vsub.s32 32, %v303_v63  ;;  %v408_v7 = vsub.s32 32, %v407_v0  ;;  %v306_v10 = vshll.u32 %v1547_v9, %v303_v63  ;;  %v309_v12 = vshll.u32 %v1548_v11, %v303_v63 }
 0x2b8   :  { %v312_v15 = vshll.u32 %v1549_v13, %v303_v63  ;;  %v315_v18 = vshll.u32 %v1550_v16, %v303_v63  ;;  %v318_v20 = vshll.u32 %v1551_v19, %v303_v63  ;;  %vm321_vm7 = vcmp.lt.s32.totalorder %v302_v62, 1 }
 0x2b9   :  { %v307_v21 = vshrl.u32 %v1548_v11, %v304_v5  ;;  %v310_v22 = vshrl.u32 %v1549_v13, %v304_v5  ;;  %v313_v23 = vshrl.u32 %v1550_v16, %v304_v5  ;;  %v305_v24 = vshrl.u32 %v1547_v9, %v304_v5 }
 0x2ba   :  { %v316_v25 = vshrl.u32 %v1551_v19, %v304_v5  ;;  %v319_v27 = vshrl.u32 %v1552_v26, %v304_v5  ;;  %vm322_vm8 = vcmp.lt.s32.totalorder %v302_v62, 2  ;;  %vm323_vm9 = vcmp.lt.s32.totalorder %v302_v62, 3 }
 0x2bb   :  { %v308_v28 = vor.u32 %v307_v21, %v306_v10  ;;  %v311_v29 = vor.u32 %v310_v22, %v309_v12  ;;  %v314_v30 = vor.u32 %v313_v23, %v312_v15  ;;  %vm324_vm10 = vcmp.lt.s32.totalorder %v302_v62, 4 }
 0x2bc   :  { %v317_v31 = vor.u32 %v316_v25, %v315_v18  ;;  %v320_v32 = vor.u32 %v319_v27, %v318_v20  ;;  %v409_v33 = vshrl.u32 %v1547_v9, %v408_v7  ;;  %v411_v46 = vshrl.u32 %v1548_v11, %v408_v7 }
 0x2bd   :  { %v325_v34 = vsel %vm321_vm7, %v305_v24, %v308_v28  ;;  %v326_v35 = vsel %vm324_vm10, %v314_v30, 2102212464  ;;  %v329_v36 = vsel %vm321_vm7, %v308_v28, %v311_v29  ;;  %v333_v37 = vsel %vm321_vm7, %v311_v29, %v314_v30 }
 0x2be   :  { %v327_v41 = vsel %vm323_vm9, %v311_v29, %v326_v35  ;;  %v330_v42 = vsel %vm324_vm10, %v317_v31, 920167782  ;;  %v334_v43 = vsel %vm324_vm10, %v320_v32, 1326507024  ;;  %v410_v50 = vshll.u32 %v1547_v9, %v407_v0 }
 0x2bf   :  { %v328_v47 = vsel %vm322_vm8, %v325_v34, %v327_v41  ;;  %v331_v48 = vsel %vm323_vm9, %v314_v30, %v330_v42  ;;  %v335_v49 = vsel %vm323_vm9, %v317_v31, %v334_v43  ;;  %v413_v54 = vshll.u32 %v1548_v11, %v407_v0 }
 0x2c0   :  { %v332_v51 = vsel %vm322_vm8, %v329_v36, %v331_v48  ;;  %v336_v52 = vsel %vm322_vm8, %v333_v37, %v335_v49  ;;  %v344_v53 = vmul.u32 %v1663_v2, %v328_v47  ;;  %v412_v59 = vor.u32 %v411_v46, %v410_v50 }
 0x2c1   :  { %v1693_v55 = vmul.u32.u64.low %v1663_v2, %v336_v52  ;;  %v1694_v56 = vmul.u32.u64.high %v1663_v2, %v336_v52, %v1693_v55  ;;  %v1697_v57 = vmul.u32.u64.low %v1663_v2, %v332_v51  ;;  %v1698_v58 = vmul.u32.u64.high %v1663_v2, %v332_v51, %v1697_v57 }
 0x2c2   :  { %v414_v60 = vshrl.u32 %v1549_v13, %v408_v7  ;;  %v416_v63 = vshll.u32 %v1549_v13, %v407_v0  ;;  %v417_v62 = vshrl.u32 %v1550_v16, %v408_v7  ;;  %v419_v5 = vshll.u32 %v1550_v16, %v407_v0 }
 0x2c3   :  { %v420_v10 = vshrl.u32 %v1551_v19, %v408_v7  ;;  %v422_v12 = vshll.u32 %v1551_v19, %v407_v0  ;;  %v423_v15 = vshrl.u32 %v1552_v26, %v408_v7  ;;  %vm425_vm11 = vcmp.lt.s32.totalorder %v1661_v1, 1 }
 0x2c4   :  { %v415_v18 = vor.u32 %v414_v60, %v413_v54  ;;  %v418_v20 = vor.u32 %v417_v62, %v416_v63  ;;  %vm426_vm12 = vcmp.lt.s32.totalorder %v1661_v1, 2  ;;  %vm346_vm13 = vc.u32 %v1694_v56, %v1697_v57 }
 0x2c5   :  { %v347_v2 = vadd.s32 1, %v1698_v58  ;;  %v421_v21 = vor.u32 %v420_v10, %v419_v5  ;;  %vm427_vm14 = vcmp.lt.s32.totalorder %v1661_v1, 3  ;;  %v424_v22 = vor.u32 %v423_v15, %v422_v12 }
 0x2c6   :  { %vm428_vm15 = vcmp.lt.s32.totalorder %v1661_v1, 4  ;;  %v429_v0 = vsel %vm425_vm11, %v409_v33, %v412_v59  ;;  %v433_v23 = vsel %vm425_vm11, %v412_v59, %v415_v18  ;;  %v437_v27 = vsel %vm425_vm11, %v415_v18, %v418_v20 }
 0x2c7   :  { %v348_v7 = vsel %vm346_vm13, %v347_v2, %v1698_v58  ;;  %v430_v24 = vsel %vm428_vm15, %v418_v20, 2102212464  ;;  %v434_v25 = vsel %vm428_vm15, %v421_v21, 920167782  ;;  %v438_v31 = vsel %vm428_vm15, %v424_v22, 1326507024 }
 0x2c8   :  { %v349_v28 = vadd.s32 %v348_v7, %v344_v53  ;;  %v431_v29 = vsel %vm427_vm14, %v415_v18, %v430_v24  ;;  %v435_v30 = vsel %vm427_vm14, %v418_v20, %v434_v25  ;;  %v439_v34 = vsel %vm427_vm14, %v421_v21, %v438_v31 }
 0x2c9   :  { %v436_v32 = vsel %vm426_vm12, %v433_v23, %v435_v30  ;;  %v497_v35 = vand.u32 2147483647, %v1648_v40  ;;  %v440_v33 = vsel %vm426_vm12, %v437_v27, %v439_v34  ;;  %v432_v42 = vsel %vm426_vm12, %v429_v0, %v431_v29 }
 0x2ca   :  { %v350_v36 = vadd.s32 536870912, %v349_v28  ;;  %v1722_v37 = vmul.u32.u64.low %v1665_v4, %v436_v32  ;;  %v1723_v41 = vmul.u32.u64.high %v1665_v4, %v436_v32, %v1722_v37  ;;  %v512_v47 = vsub.s32 32, %v1668_v8 }
 0x2cb   :  { %v1729_v43 = vmul.u32.u64.low %v1665_v4, %v440_v33  ;;  %v1730_v46 = vmul.u32.u64.high %v1665_v4, %v440_v33, %v1729_v43  ;;  %v504_v49 = vand.u32 8388607, %v497_v35  ;;  %v1738_v50 = vshrl.u32 %v1659_v61, 5 }
 0x2cc   :  { %v1733_v48 = vshrl.u32 %v350_v36, 30  ;;  %v448_v52 = vmul.u32 %v1665_v4, %v432_v42  ;;  %v451_v1 = vadd.s32 1, %v1723_v41  ;;  %v515_v53 = vshrl.u32 %v1548_v11, %v512_v47 }
 0x2cd   :  { %vm450_vm0 = vc.u32 %v1730_v46, %v1722_v37  ;;  %v518_v54 = vshrl.u32 %v1549_v13, %v512_v47  ;;  %v521_v55 = vshrl.u32 %v1550_v16, %v512_v47  ;;  %v523_v61 = vshll.u32 %v1550_v16, %v1668_v8 }
 0x2ce   :  { %v352_v51 = vshll.u32 %v1733_v48, 30  ;;  %v452_v59 = vsel %vm450_vm0, %v451_v1, %v1723_v41  ;;  %v524_v60 = vshrl.u32 %v1551_v19, %v512_v47  ;;  %v514_v63 = vshll.u32 %v1547_v9, %v1668_v8 }
 0x2cf   :  { %v453_v4 = vadd.s32 %v452_v59, %v448_v52  ;;  %v527_v62 = vshrl.u32 %v1552_v26, %v512_v47  ;;  %v517_v10 = vshll.u32 %v1548_v11, %v1668_v8  ;;  %v520_v12 = vshll.u32 %v1549_v13, %v1668_v8 }
 0x2d0   :  { %v353_v58 = vsub.s32 %v349_v28, %v352_v51  ;;  %v525_v15 = vor.u32 %v524_v60, %v523_v61  ;;  %v505_v20 = vor.u32 8388608, %v504_v49  ;;  %v516_v2 = vor.u32 %v515_v53, %v514_v63 }
 0x2d1   :  { %v454_v18 = vadd.s32 536870912, %v453_v4  ;;  %v526_v21 = vshll.u32 %v1551_v19, %v1668_v8  ;;  %v519_v0 = vor.u32 %v518_v54, %v517_v10  ;;  %v522_v23 = vor.u32 %v521_v55, %v520_v12 }
 0x2d2   :  { %v355_v5 = vsub.s32 0, %v353_v58  ;;  %vm532_vm4 = vcmp.lt.s32.totalorder %v1738_v50, 4  ;;  %vm529_vm5 = vcmp.lt.s32.totalorder %v1738_v50, 1  ;;  %vm531_vm6 = vcmp.lt.s32.totalorder %v1738_v50, 3 }
 0x2d3   :  { %v1762_v7 = vshrl.u32 %v454_v18, 30  ;;  %v528_v24 = vor.u32 %v527_v62, %v526_v21  ;;  %v538_v25 = vsel %vm532_vm4, %v525_v15, 920167782  ;;  %v545_v29 = vshll.u32 %v505_v20, 8 }
 0x2d4   :  { %v1300_v22 = vmin.u32 %v355_v5, %v353_v58  ;;  %v537_v30 = vsel %vm529_vm5, %v516_v2, %v519_v0  ;;  %v539_v31 = vsel %vm531_vm6, %v522_v23, %v538_v25  ;;  %v541_v32 = vsel %vm529_vm5, %v519_v0, %v522_v23 }
 0x2d5   :  { %v456_v28 = vshll.u32 %v1762_v7, 30  ;;  %v345_v34 = vadd.s32 %v1697_v57, %v1694_v56  ;;  %v534_v33 = vsel %vm532_vm4, %v522_v23, 2102212464  ;;  %v542_v41 = vsel %vm532_vm4, %v528_v24, 1326507024 }
 0x2d6   :  { %v357_v27 = vclz %v1300_v22  ;;  %v513_v42 = vshrl.u32 %v1547_v9, %v512_v47  ;;  %vm530_vm8 = vcmp.lt.s32.totalorder %v1738_v50, 2  ;;  %v543_v43 = vsel %vm531_vm6, %v525_v15, %v542_v41 }
 0x2d7   :  { %v457_v36 = vsub.s32 %v453_v4, %v456_v28  ;;  %v540_v56 = vsel %vm530_vm8, %v537_v30, %v539_v31  ;;  %v544_v57 = vsel %vm530_vm8, %v541_v32, %v543_v43  ;;  %v535_v47 = vsel %vm531_vm6, %v519_v0, %v534_v33 }
 0x2d8   :  { %v1301_v8 = vadd.s32 4294967294, %v357_v27  ;;  %v533_v53 = vsel %vm529_vm5, %v513_v42, %v516_v2  ;;  %v1793_v59 = vmul.u32.u64.low %v545_v29, %v544_v57  ;;  %v1794_v61 = vmul.u32.u64.high %v545_v29, %v544_v57, %v1793_v59 }
 0x2d9   :  { %v459_v51 = vsub.s32 0, %v457_v36  ;;  %v1796_v63 = vmul.u32.u64.low %v545_v29, %v540_v56  ;;  %v1797_v62 = vmul.u32.u64.high %v545_v29, %v540_v56, %v1796_v63  ;;  %v536_v15 = vsel %vm530_vm8, %v533_v53, %v535_v47 }
 0x2da   :  { %vm1302_vm7 = vcmp.lt.s32.totalorder %v1301_v8, 0  ;;  %v375_v2 = vsub.s32 4, %v1733_v48  ;;  %v552_v21 = vmul.u32 %v545_v29, %v536_v15  ;;  %v449_v50 = vadd.s32 %v1722_v37, %v1730_v46 }
 0x2db   :  { %v360_v49 = vsel %vm1302_vm7, 0, %v1301_v8  ;;  %v1304_v55 = vmin.u32 %v459_v51, %v457_v36  ;;  %vm554_vm9 = vc.u32 %v1794_v61, %v1796_v63  ;;  %v555_v20 = vadd.s32 1, %v1797_v62 }
 0x2dc   :  { %v361_v52 = vsub.s32 32, %v360_v49  ;;  %v365_v1 = vsub.s32 4294967266, %v360_v49  ;;  %v362_v54 = vshll.u32 %v353_v58, %v360_v49  ;;  %vm291_vm11 = vcmp.lt.s32.totalorder %v1644_v38, 0 }
 0x2dd   :  { %v461_v5 = vclz %v1304_v55  ;;  %v556_v24 = vsel %vm554_vm9, %v555_v20, %v1797_v62  ;;  %v376_v29 = vsel %vm291_vm11, %v375_v2, %v1733_v48  ;;  %vm290_vm12 = vcmp.le.f32.partialorder %v289_v44, 0.7853982 }
 0x2de   :  { %v363_v60 = vshrl.u32 %v345_v34, %v361_v52  ;;  %v366_v4 = vadd.s32 127, %v365_v1  ;;  %v557_v28 = vadd.s32 %v556_v24, %v552_v21  ;;  %v378_v51 = vsel %vm290_vm12, 0, %v376_v29 }
 0x2df   :  { %v1305_v18 = vadd.s32 4294967294, %v461_v5  ;;  %v479_v48 = vsub.s32 4, %v1762_v7  ;;  %v382_v1 = vadd.s32 3, %v378_v51  ;;  %vm395_vm13 = vcmp.lt.s32.totalorder %v1646_v39, 0 }
 0x2e0   :  { %v364_v10 = vor.u32 %v363_v60, %v362_v54  ;;  %v367_v12 = vshll.u32 %v366_v4, 23  ;;  %v558_v34 = vadd.s32 536870912, %v557_v28  ;;  %vm394_vm14 = vcmp.le.f32.partialorder %v393_v45, 0.7853982 }
 0x2e1   :  { %vm1306_vm10 = vcmp.lt.s32.totalorder %v1305_v18, 0  ;;  %v480_v55 = vsel %vm395_vm13, %v479_v48, %v1762_v7  ;;  %v383_v59 = vand.u32 3, %v382_v1  ;;  %v553_v45 = vadd.s32 %v1796_v63, %v1794_v61 }
 0x2e2   :  { %v368_v58 = vor.u32 4788187, %v367_v12  ;;  %v371_v0 = vcvt.s32.f32 %v364_v10  ;;  %v464_v23 = vsel %vm1306_vm10, 0, %v1305_v18  ;;  %v1811_v43 = vshrl.u32 %v558_v34, 30 }
 0x2e3   :  { %v465_v25 = vsub.s32 32, %v464_v23  ;;  %v469_v27 = vsub.s32 4294967266, %v464_v23  ;;  %v466_v30 = vshll.u32 %v457_v36, %v464_v23  ;;  %v482_v5 = vsel %vm394_vm14, 0, %v480_v55 }
 0x2e4   :  { %v369_v22 = vand.u32 2147483647, %v368_v58  ;;  %v560_v36 = vshll.u32 %v1811_v43, 30  ;;  %vm385_vm15 = vcmp.eq.s32.totalorder %v383_v59, 0  ;;  %vm388_vm4 = vcmp.eq.s32.totalorder %v383_v59, 2 }
 0x2e5   :  { %v467_v31 = vshrl.u32 %v449_v50, %v465_v25  ;;  %v470_v32 = vadd.s32 127, %v469_v27  ;;  %v486_v7 = vadd.s32 3, %v482_v5  ;;  %vm381_vm5 = vweird.f32 %v1644_v38 }
 0x2e6   :  { %v372_v8 = vmul.f32 %v371_v0, %v369_v22  ;;  %v561_v52 = vsub.s32 %v557_v28, %v560_v36  ;;  %vm384_vm6 = vcmp.lt.s32.totalorder %v383_v59, 2  ;;  %vm485_vm10 = vweird.f32 %v1646_v39  ;;  %v601_v59 = vld [vmem:[%s2079_s2] sm:$0xff] }
 0x2e7   :  { %v468_v41 = vor.u32 %v467_v31, %v466_v30  ;;  %v471_v42 = vshll.u32 %v470_v32, 23  ;;  %v487_v28 = vand.u32 3, %v486_v7 }
 0x2e8   :  { %v373_v33 = vxor.u32 2147483648, %v372_v8  ;;  %v563_v47 = vsub.s32 0, %v561_v52 }
 0x2e9   :  { %v472_v49 = vor.u32 4788187, %v471_v42  ;;  %v475_v57 = vcvt.s32.f32 %v468_v41  ;;  %vm492_vm7 = vcmp.eq.s32.totalorder %v487_v28, 2  ;;  %vm489_vm8 = vcmp.eq.s32.totalorder %v487_v28, 0 }
 0x2ea   :  { %v374_v37 = vsel %vm291_vm11, %v373_v33, %v372_v8  ;;  %v1308_v54 = vmin.u32 %v563_v47, %v561_v52  ;;  %vm488_vm9 = vcmp.lt.s32.totalorder %v487_v28, 2  ;;  %vm499_vm11 = vcmp.lt.s32.totalorder %v1648_v40, 0 }
 0x2eb   :  { %v377_v46 = vsel %vm290_vm12, %v1644_v38, %v374_v37  ;;  %v473_v56 = vand.u32 2147483647, %v472_v49  ;;  %v583_v37 = vsub.s32 4, %v1811_v43  ;;  %vm498_vm12 = vcmp.le.f32.partialorder %v497_v35, 0.7853982 }
 0x2ec   :  { %1492 = vcosq.f32 %v377_v46  ;;  %v565_v4 = vclz %v1308_v54 }
 0x2ed   :  { %1494 = vsinq.f32 %v377_v46  ;;  %v476_v53 = vmul.f32 %v475_v57, %v473_v56  ;;  %v584_v57 = vsel %vm499_vm11, %v583_v37, %v1811_v43 }
 0x2ee   :  { %v1309_v10 = vadd.s32 4294967294, %v565_v4  ;;  %v586_v48 = vsel %vm498_vm12, 0, %v584_v57  ;;  %v602_v4 = vld [vmem:[%s2079_s2 + $0x8] sm:$0xff] }
 0x2ef   :  { %v477_v44 = vxor.u32 2147483648, %v476_v53 }
 0x2f0   :  { %vm1310_vm0 = vcmp.lt.s32.totalorder %v1309_v10, 0 }
 0x2f1   :  { %v478_v60 = vsel %vm395_vm13, %v477_v44, %v476_v53  ;;  %v568_v20 = vsel %vm1310_vm0, 0, %v1309_v10  ;;  %vm589_vm0 = vweird.f32 %v1648_v40 }
 0x2f2   :  { %v481_v62 = vsel %vm394_vm14, %v1646_v39, %v478_v60  ;;  %v569_v21 = vsub.s32 32, %v568_v20  ;;  %v573_v22 = vsub.s32 4294967266, %v568_v20  ;;  %v570_v24 = vshll.u32 %v561_v52, %v568_v20 }
 0x2f3   :  { %1496 = vcosq.f32 %v481_v62  ;;  %v590_v39 = vadd.s32 3, %v586_v48 }
 0x2f4   :  { %1498 = vsinq.f32 %v481_v62  ;;  %v571_v50 = vshrl.u32 %v553_v45, %v569_v21  ;;  %v574_v25 = vadd.s32 127, %v573_v22  ;;  %v610_v62 = vpop.permute.xlu0 %609 }
 0x2f5   :  { %v591_v1 = vand.u32 3, %v590_v39 }
 0x2f6   :  { %v1493_v12 = vpop.eup %1492  ;;  %v572_v8 = vor.u32 %v571_v50, %v570_v24  ;;  %v575_v30 = vshll.u32 %v574_v25, 23 }
 0x2f7   :  { %v1495_v15 = vpop.eup %1494  ;;  %v389_v18 = vxor.u32 2147483648, %v1493_v12  ;;  %vm596_vm13 = vcmp.eq.s32.totalorder %v591_v1, 2  ;;  %vm593_vm14 = vcmp.eq.s32.totalorder %v591_v1, 0 }
 0x2f8   :  { %v386_v58 = vxor.u32 2147483648, %v1495_v15  ;;  %v576_v32 = vor.u32 4788187, %v575_v30  ;;  %v579_v63 = vcvt.s32.f32 %v572_v8 }
 0x2f9   :  { %v390_v2 = vsel %vm388_vm4, %v389_v18, %v1495_v15 }
 0x2fa   :  { %v387_v0 = vsel %vm385_vm15, %v1493_v12, %v386_v58  ;;  %v577_v61 = vand.u32 2147483647, %v576_v32  ;;  %vm592_vm15 = vcmp.lt.s32.totalorder %v591_v1, 2  ;;  %v615_v12 = vpop.permute.xlu0 %614 }
 0x2fb   :  { %v391_v23 = vsel %vm384_vm6, %v387_v0, %v390_v2  ;;  %v620_v2 = vpop.permute.xlu1 %619 }
 0x2fc   :  { %v392_v27 = vsel %vm381_vm5, nan, %v391_v23  ;;  %v580_v42 = vmul.f32 %v579_v63, %v577_v61 }
 0x2fd   :  { %v1497_v31 = vpop.eup %1496 }
 0x2fe   :  { %v1499_v34 = vpop.eup %1498  ;;  %v493_v33 = vxor.u32 2147483648, %v1497_v31  ;;  %v581_v36 = vxor.u32 2147483648, %v580_v42 }
 0x2ff   :  { %v490_v29 = vxor.u32 2147483648, %v1499_v34 }
 0x300   :  { %v494_v38 = vsel %vm492_vm7, %v493_v33, %v1499_v34  ;;  %v582_v56 = vsel %vm499_vm11, %v581_v36, %v580_v42 }
 0x301   :  { %v491_v41 = vsel %vm489_vm8, %v1497_v31, %v490_v29  ;;  %v585_v52 = vsel %vm498_vm12, %v1648_v40, %v582_v56  ;;  %v603_v40 = vld [vmem:[%s2079_s2 + $0x10] sm:$0xf] }
 0x302   :  { %v495_v46 = vsel %vm488_vm9, %v491_v41, %v494_v38  ;;  %1500 = vcosq.f32 %v585_v52 }
 0x303   :  { %v496_v49 = vsel %vm485_vm10, nan, %v495_v46  ;;  %1502 = vsinq.f32 %v585_v52 }
 0x304   :  { %v1441_v51 = vpack.c.bf16 %v496_v49, %v392_v27 }
 0x306   :  { %1442 = vmatpush3.bf16.msra.mxu0 %v1441_v51 }
 0x307   :  { %1396 = vmatprep.subr.mxu0 %v1542_v3 }
 0x30c   :  { %v1501_v53 = vpop.eup %1500 }
 0x30d   :  { %v1503_v47 = vpop.eup %1502  ;;  %v597_v44 = vxor.u32 2147483648, %v1501_v53 }
 0x30e   :  { %v594_v54 = vxor.u32 2147483648, %v1503_v47 }
 0x30f   :  { %v598_v35 = vsel %vm596_vm13, %v597_v44, %v1503_v47 }
 0x310   :  { %v595_v55 = vsel %vm593_vm14, %v1501_v53, %v594_v54 }
 0x311   :  { %v599_v43 = vsel %vm592_vm15, %v595_v55, %v598_v35 }
 0x312   :  { %v600_v60 = vsel %vm589_vm0, nan, %v599_v43 }
 0x313   :  { %1397 = vmatpush3.msk.msra.mxu0 %vm124_vm2, %v600_v60 }
 0x314   :  { %1399 = vmatmul.mubr.msk.f32.vlgmr.msra.gmra.mrb[6].mxu0 %vm120_vm3, %v601_v59  ;;  %1449 = vmatprep.subr.bf16.mxu0 %v1544_v6 }
 0x315   :  { %1401 = vmatprep.mubr.msk.f32.mxu0 %vm1543_vm1, %v1542_v3 }
 0x318   :  { %1402 = vmatmul.mubr.msk.f32.gmra.mrb[8].mxu0 %vm120_vm3, %v602_v4 }
 0x319   :  { %1404 = vmatprep.mubr.msk.f32.mxu0 %vm1543_vm1, %v1542_v3 }
 0x31c   :  { %1405 = vmatmul.mubr.msk.f32.gmra.mrb[10].mxu0 %vm120_vm3, %v603_v40 }
 0x31d   :  { %1431 = vmatprep.mubr.msk.f32.mxu0 %vm1543_vm1, %v1542_v3 }
 0x3e7   :  { %v700_v5 = vpop.f32.mrb[6].mxu0 }
 0x3e8   :  { %v1400_v10 = vpop.f32.mrb[7].mxu0  ;;  %v701_v18 = vadd.f32 %v700_v5, %v610_v62 }
 0x3eb   :  { %v705_v15 = vpop.f32.mrb[8].mxu0 }
 0x3ec   :  { %v706_v58 = vadd.f32 %v705_v15, %v615_v12  ;;  %v1403_v7 = vpop.f32.mrb[9].mxu0 }
 0x3ee   :  { %v1444_v20 = vpack.c.bf16 %v706_v58, %v701_v18 }
 0x3ef   :  { %v710_v45 = vpop.f32.mrb[10].mxu0 }
 0x3f0   :  { %v711_v21 = vadd.f32 %v710_v45, %v620_v2  ;;  %1445 = vmatpush3.bf16.msra.mxu1 %v1444_v20  ;;  %v1406_v22 = vpop.f32.mrb[11].mxu0 }
 0x3f1   :  { %1411 = vmatprep.subr.mxu1 %v1542_v3 }
 0x3f4   :  { %1412 = vmatpush3.msk.msra.mxu1 %vm124_vm2, %v711_v21 }
 0x3f5   :  { %1414 = vmatmul.mubr.msk.f32.vlgmr.msra.gmra.mrb[4].mxu1 %vm120_vm3, %v1545_v14  ;;  %1446 = vmatprep.subr.bf16.mxu1 %v1544_v6 }
 0x3f6   :  { %1422 = vmatprep.mubr.msk.f32.mxu1 %vm1543_vm1, %v1542_v3 }
 0x4c8   :  { %v783_v0 = vpop.f32.mrb[4].mxu1 }
 0x4c9   :  { %v790_v23 = vrot.slane %v783_v0, %v1624_v17  ;;  %v1415_v24 = vpop.f32.mrb[5].mxu1 }
 0x4cb   :  { %v791_v50 = vsub.f32 %v701_v18, %v790_v23  ;;  %v792_v25 = vsub.f32 %v706_v58, %v790_v23  ;;  %v793_v8 = vsub.f32 %v711_v21, %v790_v23 }
 0x4cd   :  { %v794_v27 = vmul.f32 %v791_v50, %v791_v50  ;;  %v795_v28 = vmul.f32 %v792_v25, %v792_v25  ;;  %v796_v31 = vmul.f32 %v793_v8, %v793_v8 }
 0x4cf   :  { %v1447_v30 = vpack.c.bf16 %v795_v28, %v794_v27 }
 0x4d1   :  { %1448 = vmatpush3.bf16.msra.mxu1 %v1447_v30 }
 0x4d2   :  { %1420 = vmatprep.subr.mxu1 %v1542_v3 }
 0x4d5   :  { %1421 = vmatpush3.msk.msra.mxu1 %vm124_vm2, %v796_v31 }
 0x4d6   :  { %1423 = vmatmul.mubr.msk.f32.vlgmr.msra.gmra.mrb[6].mxu1 %vm120_vm3, %v1545_v14 }
 0x5a9   :  { %v866_v6 = vpop.f32.mrb[6].mxu1 }
 0x5aa   :  { %v867_v32 = vadd.f32 1e-05, %v866_v6  ;;  %v1424_v34 = vpop.f32.mrb[7].mxu1 }
 0x5ac   :  { %1504 = vrsqrt.f32 %v867_v32 }
 0x5b6   :  { %v1505_v33 = vpop.eup %1504 }
 0x5b7   :  { %v874_v29 = vrot.slane %v1505_v33, %v1624_v17 }
 0x5b9   :  { %v1868_v61 = vmul.f32 %v874_v29, %v791_v50  ;;  %v1870_v63 = vmul.f32 %v874_v29, %v792_v25  ;;  %v1872_v38 = vmul.f32 %v874_v29, %v793_v8 }
 0x5bb   :  { %v881_v41 = vand.u32 2139095040, %v1868_v61  ;;  %v985_v42 = vand.u32 2139095040, %v1870_v63  ;;  %v1089_v37 = vand.u32 2139095040, %v1872_v38  ;;  %v878_v14 = vand.u32 2147483647, %v1868_v61 }
 0x5bc   :  { %v982_v46 = vand.u32 2147483647, %v1870_v63 }
 0x5bd   :  { %v882_v49 = vshrl.u32 %v881_v41, 23  ;;  %v986_v36 = vshrl.u32 %v985_v42, 23  ;;  %v1090_v51 = vshrl.u32 %v1089_v37, 23  ;;  %v885_v56 = vand.u32 8388607, %v878_v14 }
 0x5be   :  { %v989_v57 = vand.u32 8388607, %v982_v46 }
 0x5bf   :  { %v1319_v52 = vadd.s32 4294967169, %v882_v49  ;;  %v1323_v48 = vadd.s32 4294967169, %v986_v36  ;;  %v1327_v39 = vadd.s32 4294967169, %v1090_v51  ;;  %v886_v44 = vor.u32 8388608, %v885_v56 }
 0x5c0   :  { %v990_v54 = vor.u32 8388608, %v989_v57 }
 0x5c1   :  { %v888_v1 = vadd.s32 1, %v1319_v52  ;;  %v992_v53 = vadd.s32 1, %v1323_v48  ;;  %v1096_v47 = vadd.s32 1, %v1327_v39  ;;  %v1887_v62 = vshll.u32 %v886_v44, 8 }
 0x5c2   :  { %v1889_v5 = vshll.u32 %v990_v54, 8 }
 0x5c3   :  { %vm889_vm1 = vcmp.gt.s32.totalorder %v888_v1, 0  ;;  %vm993_vm4 = vcmp.gt.s32.totalorder %v992_v53, 0  ;;  %vm1097_vm5 = vcmp.gt.s32.totalorder %v1096_v47, 0 }
 0x5c4   :  { %v890_v35 = vsel %vm889_vm1, %v888_v1, 0  ;;  %v994_v55 = vsel %vm993_vm4, %v992_v53, 0  ;;  %v1883_v43 = vsel %vm1097_vm5, %v1096_v47, 0 }
 0x5c5   :  { %v891_v59 = vshrl.u32 %v890_v35, 5  ;;  %v892_v60 = vand.u32 31, %v890_v35  ;;  %v996_v4 = vand.u32 31, %v994_v55  ;;  %v1885_v40 = vshrl.u32 %v994_v55, 5 }
 0x5c6   :  { %v1892_v15 = vand.u32 31, %v1883_v43 }
 0x5c7   :  { %v893_v10 = vsub.s32 32, %v892_v60  ;;  %v997_v12 = vsub.s32 32, %v996_v4  ;;  %v895_v18 = vshll.u32 %v1547_v9, %v892_v60  ;;  %v898_v58 = vshll.u32 %v1548_v11, %v892_v60 }
 0x5c8   :  { %v901_v7 = vshll.u32 %v1549_v13, %v892_v60  ;;  %v904_v20 = vshll.u32 %v1550_v16, %v892_v60  ;;  %v907_v2 = vshll.u32 %v1551_v19, %v892_v60  ;;  %vm910_vm6 = vcmp.lt.s32.totalorder %v891_v59, 1 }
 0x5c9   :  { %v896_v45 = vshrl.u32 %v1548_v11, %v893_v10  ;;  %v899_v21 = vshrl.u32 %v1549_v13, %v893_v10  ;;  %v902_v22 = vshrl.u32 %v1550_v16, %v893_v10  ;;  %v894_v0 = vshrl.u32 %v1547_v9, %v893_v10 }
 0x5ca   :  { %v905_v23 = vshrl.u32 %v1551_v19, %v893_v10  ;;  %v908_v24 = vshrl.u32 %v1552_v26, %v893_v10  ;;  %vm911_vm7 = vcmp.lt.s32.totalorder %v891_v59, 2  ;;  %vm912_vm8 = vcmp.lt.s32.totalorder %v891_v59, 3 }
 0x5cb   :  { %v897_v50 = vor.u32 %v896_v45, %v895_v18  ;;  %v900_v25 = vor.u32 %v899_v21, %v898_v58  ;;  %v903_v27 = vor.u32 %v902_v22, %v901_v7  ;;  %vm913_vm9 = vcmp.lt.s32.totalorder %v891_v59, 4 }
 0x5cc   :  { %v906_v28 = vor.u32 %v905_v23, %v904_v20  ;;  %v909_v8 = vor.u32 %v908_v24, %v907_v2  ;;  %v998_v30 = vshrl.u32 %v1547_v9, %v997_v12  ;;  %v1000_v42 = vshrl.u32 %v1548_v11, %v997_v12 }
 0x5cd   :  { %v914_v31 = vsel %vm910_vm6, %v894_v0, %v897_v50  ;;  %v915_v6 = vsel %vm913_vm9, %v903_v27, 2102212464  ;;  %v918_v32 = vsel %vm910_vm6, %v897_v50, %v900_v25  ;;  %v922_v34 = vsel %vm910_vm6, %v900_v25, %v903_v27 }
 0x5ce   :  { %v916_v33 = vsel %vm912_vm8, %v900_v25, %v915_v6  ;;  %v919_v29 = vsel %vm913_vm9, %v906_v28, 920167782  ;;  %v923_v41 = vsel %vm913_vm9, %v909_v8, 1326507024  ;;  %v999_v51 = vshll.u32 %v1547_v9, %v996_v4 }
 0x5cf   :  { %v917_v37 = vsel %vm911_vm7, %v914_v31, %v916_v33  ;;  %v920_v49 = vsel %vm912_vm8, %v903_v27, %v919_v29  ;;  %v924_v36 = vsel %vm912_vm8, %v906_v28, %v923_v41  ;;  %v1002_v48 = vshll.u32 %v1548_v11, %v996_v4 }
 0x5d0   :  { %v921_v56 = vsel %vm911_vm7, %v918_v32, %v920_v49  ;;  %v925_v57 = vsel %vm911_vm7, %v922_v34, %v924_v36  ;;  %v933_v52 = vmul.u32 %v1887_v62, %v917_v37  ;;  %v1001_v44 = vor.u32 %v1000_v42, %v999_v51 }
 0x5d1   :  { %v1917_v39 = vmul.u32.u64.low %v1887_v62, %v925_v57  ;;  %v1918_v1 = vmul.u32.u64.high %v1887_v62, %v925_v57, %v1917_v39  ;;  %v1921_v53 = vmul.u32.u64.low %v1887_v62, %v921_v56  ;;  %v1922_v47 = vmul.u32.u64.high %v1887_v62, %v921_v56, %v1921_v53 }
 0x5d2   :  { %v1003_v54 = vshrl.u32 %v1549_v13, %v997_v12  ;;  %v1005_v35 = vshll.u32 %v1549_v13, %v996_v4  ;;  %v1006_v55 = vshrl.u32 %v1550_v16, %v997_v12  ;;  %v1008_v59 = vshll.u32 %v1550_v16, %v996_v4 }
 0x5d3   :  { %v1009_v60 = vshrl.u32 %v1551_v19, %v997_v12  ;;  %v1011_v10 = vshll.u32 %v1551_v19, %v996_v4  ;;  %v1012_v18 = vshrl.u32 %v1552_v26, %v997_v12  ;;  %vm1014_vm10 = vcmp.lt.s32.totalorder %v1885_v40, 1 }
 0x5d4   :  { %v1004_v58 = vor.u32 %v1003_v54, %v1002_v48  ;;  %v1007_v7 = vor.u32 %v1006_v55, %v1005_v35  ;;  %vm1015_vm11 = vcmp.lt.s32.totalorder %v1885_v40, 2  ;;  %vm935_vm12 = vc.u32 %v1918_v1, %v1921_v53 }
 0x5d5   :  { %v936_v62 = vadd.s32 1, %v1922_v47  ;;  %v1010_v20 = vor.u32 %v1009_v60, %v1008_v59  ;;  %vm1016_vm13 = vcmp.lt.s32.totalorder %v1885_v40, 3  ;;  %v1013_v2 = vor.u32 %v1012_v18, %v1011_v10 }
 0x5d6   :  { %vm1017_vm14 = vcmp.lt.s32.totalorder %v1885_v40, 4  ;;  %v1018_v4 = vsel %vm1014_vm10, %v998_v30, %v1001_v44  ;;  %v1022_v45 = vsel %vm1014_vm10, %v1001_v44, %v1004_v58  ;;  %v1026_v0 = vsel %vm1014_vm10, %v1004_v58, %v1007_v7 }
 0x5d7   :  { %v937_v12 = vsel %vm935_vm12, %v936_v62, %v1922_v47  ;;  %v1019_v21 = vsel %vm1017_vm14, %v1007_v7, 2102212464  ;;  %v1023_v22 = vsel %vm1017_vm14, %v1010_v20, 920167782  ;;  %v1027_v25 = vsel %vm1017_vm14, %v1013_v2, 1326507024 }
 0x5d8   :  { %v938_v23 = vadd.s32 %v937_v12, %v933_v52  ;;  %v1020_v24 = vsel %vm1016_vm13, %v1004_v58, %v1019_v21  ;;  %v1024_v50 = vsel %vm1016_vm13, %v1007_v7, %v1023_v22  ;;  %v1028_v28 = vsel %vm1016_vm13, %v1010_v20, %v1027_v25 }
 0x5d9   :  { %v1025_v27 = vsel %vm1015_vm11, %v1022_v45, %v1024_v50  ;;  %v1086_v8 = vand.u32 2147483647, %v1872_v38  ;;  %v1029_v30 = vsel %vm1015_vm11, %v1026_v0, %v1028_v28  ;;  %v1021_v34 = vsel %vm1015_vm11, %v1018_v4, %v1020_v24 }
 0x5da   :  { %v939_v31 = vadd.s32 536870912, %v938_v23  ;;  %v1946_v6 = vmul.u32.u64.low %v1889_v5, %v1025_v27  ;;  %v1947_v32 = vmul.u32.u64.high %v1889_v5, %v1025_v27, %v1946_v6  ;;  %v1101_v41 = vsub.s32 32, %v1892_v15 }
 0x5db   :  { %v1953_v33 = vmul.u32.u64.low %v1889_v5, %v1029_v30  ;;  %v1954_v29 = vmul.u32.u64.high %v1889_v5, %v1029_v30, %v1953_v33  ;;  %v1093_v37 = vand.u32 8388607, %v1086_v8  ;;  %v1962_v49 = vshrl.u32 %v1883_v43, 5 }
 0x5dc   :  { %v1957_v42 = vshrl.u32 %v939_v31, 30  ;;  %v1037_v51 = vmul.u32 %v1889_v5, %v1021_v34  ;;  %v1040_v40 = vadd.s32 1, %v1947_v32  ;;  %v1104_v56 = vshrl.u32 %v1548_v11, %v1101_v41 }
 0x5dd   :  { %vm1039_vm15 = vc.u32 %v1954_v29, %v1946_v6  ;;  %v1107_v57 = vshrl.u32 %v1549_v13, %v1101_v41  ;;  %v1110_v52 = vshrl.u32 %v1550_v16, %v1101_v41  ;;  %v1112_v43 = vshll.u32 %v1550_v16, %v1892_v15 }
 0x5de   :  { %v941_v36 = vshll.u32 %v1957_v42, 30  ;;  %v1041_v39 = vsel %vm1039_vm15, %v1040_v40, %v1947_v32  ;;  %v1113_v47 = vshrl.u32 %v1551_v19, %v1101_v41  ;;  %v1103_v44 = vshll.u32 %v1547_v9, %v1892_v15 }
 0x5df   :  { %v1042_v5 = vadd.s32 %v1041_v39, %v1037_v51  ;;  %v1116_v54 = vshrl.u32 %v1552_v26, %v1101_v41  ;;  %v1106_v55 = vshll.u32 %v1548_v11, %v1892_v15  ;;  %v1109_v59 = vshll.u32 %v1549_v13, %v1892_v15 }
 0x5e0   :  { %v942_v48 = vsub.s32 %v938_v23, %v941_v36  ;;  %v1114_v60 = vor.u32 %v1113_v47, %v1112_v43  ;;  %v1094_v18 = vor.u32 8388608, %v1093_v37  ;;  %v1105_v58 = vor.u32 %v1104_v56, %v1103_v44 }
 0x5e1   :  { %v1043_v10 = vadd.s32 536870912, %v1042_v5  ;;  %v1115_v16 = vshll.u32 %v1551_v19, %v1892_v15  ;;  %v1108_v62 = vor.u32 %v1107_v57, %v1106_v55  ;;  %v1111_v20 = vor.u32 %v1110_v52, %v1109_v59 }
 0x5e2   :  { %v944_v35 = vsub.s32 0, %v942_v48  ;;  %vm1121_vm0 = vcmp.lt.s32.totalorder %v1962_v49, 4  ;;  %vm1118_vm1 = vcmp.lt.s32.totalorder %v1962_v49, 1  ;;  %vm1120_vm4 = vcmp.lt.s32.totalorder %v1962_v49, 3 }
 0x5e3   :  { %v1986_v26 = vshrl.u32 %v1043_v10, 30  ;;  %v1117_v2 = vor.u32 %v1116_v54, %v1115_v16  ;;  %v1127_v11 = vsel %vm1121_vm0, %v1114_v60, 920167782  ;;  %v1134_v45 = vshll.u32 %v1094_v18, 8 }
 0x5e4   :  { %v1320_v7 = vmin.u32 %v944_v35, %v942_v48  ;;  %v1126_v15 = vsel %vm1118_vm1, %v1105_v58, %v1108_v62  ;;  %v1128_v12 = vsel %vm1120_vm4, %v1111_v20, %v1127_v11  ;;  %v1130_v21 = vsel %vm1118_vm1, %v1108_v62, %v1111_v20 }
 0x5e5   :  { %v1045_v13 = vshll.u32 %v1986_v26, 30  ;;  %v934_v22 = vadd.s32 %v1921_v53, %v1918_v1  ;;  %v1123_v23 = vsel %vm1121_vm0, %v1111_v20, 2102212464  ;;  %v1131_v24 = vsel %vm1121_vm0, %v1117_v2, 1326507024 }
 0x5e6   :  { %v946_v4 = vclz %v1320_v7  ;;  %v1102_v50 = vshrl.u32 %v1547_v9, %v1101_v41  ;;  %vm1119_vm6 = vcmp.lt.s32.totalorder %v1962_v49, 2  ;;  %v1132_v25 = vsel %vm1120_vm4, %v1114_v60, %v1131_v24 }
 0x5e7   :  { %v1046_v0 = vsub.s32 %v1042_v5, %v1045_v13  ;;  %v1129_v1 = vsel %vm1119_vm6, %v1126_v15, %v1128_v12  ;;  %v1133_v53 = vsel %vm1119_vm6, %v1130_v21, %v1132_v25  ;;  %v1124_v9 = vsel %vm1120_vm4, %v1108_v62, %v1123_v23 }
 0x5e8   :  { %v1321_v19 = vadd.s32 4294967294, %v946_v4  ;;  %v1122_v32 = vsel %vm1118_vm1, %v1102_v50, %v1105_v58  ;;  %v2017_v41 = vmul.u32.u64.low %v1134_v45, %v1133_v53  ;;  %v2018_v37 = vmul.u32.u64.high %v1134_v45, %v1133_v53, %v2017_v41 }
 0x5e9   :  { %v1048_v28 = vsub.s32 0, %v1046_v0  ;;  %v2020_v40 = vmul.u32.u64.low %v1134_v45, %v1129_v1  ;;  %v2021_v56 = vmul.u32.u64.high %v1134_v45, %v1129_v1, %v2020_v40  ;;  %v1125_v43 = vsel %vm1119_vm6, %v1122_v32, %v1124_v9 }
 0x5ea   :  { %vm1322_vm5 = vcmp.lt.s32.totalorder %v1321_v19, 0  ;;  %v964_v44 = vsub.s32 4, %v1957_v42  ;;  %v1141_v54 = vmul.u32 %v1134_v45, %v1125_v43  ;;  %v1038_v49 = vadd.s32 %v1946_v6, %v1954_v29 }
 0x5eb   :  { %v949_v27 = vsel %vm1322_vm5, 0, %v1321_v19  ;;  %v1324_v33 = vmin.u32 %v1048_v28, %v1046_v0  ;;  %vm1143_vm7 = vc.u32 %v2018_v37, %v2020_v40  ;;  %v1144_v5 = vadd.s32 1, %v2021_v56 }
 0x5ec   :  { %v950_v31 = vsub.s32 32, %v949_v27  ;;  %v954_v30 = vsub.s32 4294967266, %v949_v27  ;;  %v951_v34 = vshll.u32 %v942_v48, %v949_v27  ;;  %vm880_vm9 = vcmp.lt.s32.totalorder %v1868_v61, 0 }
 0x5ed   :  { %v1050_v57 = vclz %v1324_v33  ;;  %v1145_v60 = vsel %vm1143_vm7, %v1144_v5, %v2021_v56  ;;  %v965_v4 = vsel %vm880_vm9, %v964_v44, %v1957_v42  ;;  %vm879_vm10 = vcmp.le.f32.partialorder %v878_v14, 0.7853982 }
 0x5ee   :  { %v952_v36 = vshrl.u32 %v934_v22, %v950_v31  ;;  %v955_v51 = vadd.s32 127, %v954_v30  ;;  %v1146_v58 = vadd.s32 %v1145_v60, %v1141_v54  ;;  %v967_v21 = vsel %vm879_vm10, 0, %v965_v4 }
 0x5ef   :  { %v1325_v47 = vadd.s32 4294967294, %v1050_v57  ;;  %v1068_v42 = vsub.s32 4, %v1986_v26  ;;  %v971_v24 = vadd.s32 3, %v967_v21  ;;  %vm984_vm11 = vcmp.lt.s32.totalorder %v1870_v63, 0 }
 0x5f0   :  { %v953_v52 = vor.u32 %v952_v36, %v951_v34  ;;  %v956_v39 = vshll.u32 %v955_v51, 23  ;;  %v1147_v2 = vadd.s32 536870912, %v1146_v58  ;;  %vm983_vm12 = vcmp.le.f32.partialorder %v982_v46, 0.7853982 }
 0x5f1   :  { %vm1326_vm8 = vcmp.lt.s32.totalorder %v1325_v47, 0  ;;  %v1069_v28 = vsel %vm984_vm11, %v1068_v42, %v1986_v26  ;;  %v972_v1 = vand.u32 3, %v971_v24  ;;  %v1142_v46 = vadd.s32 %v2020_v40, %v2018_v37  ;;  %v1195_v42 = vpop.permute.xlu1 %1194 }
 0x5f2   :  { %v957_v48 = vor.u32 4788187, %v956_v39  ;;  %v960_v55 = vcvt.s32.f32 %v953_v52  ;;  %v1053_v59 = vsel %vm1326_vm8, 0, %v1325_v47  ;;  %v2035_v19 = vshrl.u32 %v1147_v2, 30 }
 0x5f3   :  { %v1054_v10 = vsub.s32 32, %v1053_v59  ;;  %v1058_v18 = vsub.s32 4294967266, %v1053_v59  ;;  %v1055_v7 = vshll.u32 %v1046_v0, %v1053_v59  ;;  %v1071_v32 = vsel %vm983_vm12, 0, %v1069_v28 }
 0x5f4   :  { %v958_v35 = vand.u32 2147483647, %v957_v48  ;;  %v1149_v12 = vshll.u32 %v2035_v19, 30  ;;  %vm974_vm13 = vcmp.eq.s32.totalorder %v972_v1, 0  ;;  %vm977_vm15 = vcmp.eq.s32.totalorder %v972_v1, 2 }
 0x5f5   :  { %v1056_v62 = vshrl.u32 %v1038_v49, %v1054_v10  ;;  %v1059_v20 = vadd.s32 127, %v1058_v18  ;;  %v1075_v26 = vadd.s32 3, %v1071_v32  ;;  %vm970_vm0 = vweird.f32 %v1868_v61 }
 0x5f6   :  { %v961_v16 = vmul.f32 %v960_v55, %v958_v35  ;;  %v1150_v23 = vsub.s32 %v1146_v58, %v1149_v12  ;;  %vm973_vm1 = vcmp.lt.s32.totalorder %v972_v1, 2  ;;  %vm1074_vm7 = vweird.f32 %v1870_v63 }
 0x5f7   :  { %v1057_v13 = vor.u32 %v1056_v62, %v1055_v7  ;;  %v1060_v45 = vshll.u32 %v1059_v20, 23  ;;  %v1076_v54 = vand.u32 3, %v1075_v26  ;;  %v1172_v7 = vsub.s32 4, %v2035_v19 }
 0x5f8   :  { %v962_v11 = vxor.u32 2147483648, %v961_v16  ;;  %v1152_v25 = vsub.s32 0, %v1150_v23  ;;  %vm1088_vm8 = vcmp.lt.s32.totalorder %v1872_v38, 0  ;;  %v1200_v24 = vrot.slane %v1195_v42, %v1624_v17 }
 0x5f9   :  { %v1061_v15 = vor.u32 4788187, %v1060_v45  ;;  %v1064_v0 = vcvt.s32.f32 %v1057_v13  ;;  %vm1081_vm4 = vcmp.eq.s32.totalorder %v1076_v54, 2  ;;  %vm1078_vm5 = vcmp.eq.s32.totalorder %v1076_v54, 0 }
 0x5fa   :  { %v963_v6 = vsel %vm880_vm9, %v962_v11, %v961_v16  ;;  %v1328_v27 = vmin.u32 %v1152_v25, %v1150_v23  ;;  %vm1077_vm6 = vcmp.lt.s32.totalorder %v1076_v54, 2  ;;  %vm1087_vm9 = vcmp.le.f32.partialorder %v1086_v8, 0.7853982 }
 0x5fb   :  { %v966_v29 = vsel %vm879_vm10, %v1868_v61, %v963_v6  ;;  %v1062_v22 = vand.u32 2147483647, %v1061_v15  ;;  %v1173_v13 = vsel %vm1088_vm8, %v1172_v7, %v2035_v19 }
 0x5fc   :  { %1506 = vcosq.f32 %v966_v29  ;;  %v1154_v31 = vclz %v1328_v27  ;;  %v1175_v6 = vsel %vm1087_vm9, 0, %v1173_v13 }
 0x5fd   :  { %1508 = vsinq.f32 %v966_v29  ;;  %v1065_v50 = vmul.f32 %v1064_v0, %v1062_v22 }
 0x5fe   :  { %v1329_v9 = vadd.s32 4294967294, %v1154_v31 }
 0x5ff   :  { %v1066_v14 = vxor.u32 2147483648, %v1065_v50 }
 0x600   :  { %vm1330_vm14 = vcmp.lt.s32.totalorder %v1329_v9, 0 }
 0x601   :  { %v1067_v53 = vsel %vm984_vm11, %v1066_v14, %v1065_v50  ;;  %v1157_v51 = vsel %vm1330_vm14, 0, %v1329_v9 }
 0x602   :  { %v1070_v30 = vsel %vm983_vm12, %v1870_v63, %v1067_v53  ;;  %v1158_v57 = vsub.s32 32, %v1157_v51  ;;  %v1162_v52 = vsub.s32 4294967266, %v1157_v51  ;;  %v1159_v47 = vshll.u32 %v1150_v23, %v1157_v51 }
 0x603   :  { %1510 = vcosq.f32 %v1070_v30  ;;  %v1179_v63 = vadd.s32 3, %v1175_v6 }
 0x604   :  { %1512 = vsinq.f32 %v1070_v30  ;;  %v1160_v48 = vshrl.u32 %v1142_v46, %v1158_v57  ;;  %v1163_v5 = vadd.s32 127, %v1162_v52 }
 0x605   :  { %v1180_v29 = vand.u32 3, %v1179_v63 }
 0x606   :  { %v1507_v34 = vpop.eup %1506  ;;  %v1161_v35 = vor.u32 %v1160_v48, %v1159_v47  ;;  %v1164_v55 = vshll.u32 %v1163_v5, 23 }
 0x607   :  { %v1509_v33 = vpop.eup %1508  ;;  %v978_v41 = vxor.u32 2147483648, %v1507_v34  ;;  %vm1185_vm10 = vcmp.eq.s32.totalorder %v1180_v29, 2  ;;  %vm1182_vm11 = vcmp.eq.s32.totalorder %v1180_v29, 0  ;;  %vm1181_vm12 = vcmp.lt.s32.totalorder %v1180_v29, 2 }
 0x608   :  { %v975_v36 = vxor.u32 2147483648, %v1509_v33  ;;  %v1165_v60 = vor.u32 4788187, %v1164_v55  ;;  %v1168_v40 = vcvt.s32.f32 %v1161_v35 }
 0x609   :  { %v979_v56 = vsel %vm977_vm15, %v978_v41, %v1509_v33 }
 0x60a   :  { %v976_v39 = vsel %vm974_vm13, %v1507_v34, %v975_v36  ;;  %v1166_v37 = vand.u32 2147483647, %v1165_v60  ;;  %vm1178_vm13 = vweird.f32 %v1872_v38 }
 0x60b   :  { %v980_v43 = vsel %vm973_vm1, %v976_v39, %v979_v56 }
 0x60c   :  { %v981_v44 = vsel %vm970_vm0, nan, %v980_v43  ;;  %v1169_v16 = vmul.f32 %v1168_v40, %v1166_v37 }
 0x60d   :  { %v1511_v59 = vpop.eup %1510 }
 0x60e   :  { %v1513_v49 = vpop.eup %1512  ;;  %v1082_v10 = vxor.u32 2147483648, %v1511_v59  ;;  %v1170_v2 = vxor.u32 2147483648, %v1169_v16 }
 0x60f   :  { %v1079_v18 = vxor.u32 2147483648, %v1513_v49 }
 0x610   :  { %v1083_v61 = vsel %vm1081_vm4, %v1082_v10, %v1513_v49  ;;  %v1171_v4 = vsel %vm1088_vm8, %v1170_v2, %v1169_v16 }
 0x611   :  { %v1080_v58 = vsel %vm1078_vm5, %v1511_v59, %v1079_v18  ;;  %v1174_v45 = vsel %vm1087_vm9, %v1872_v38, %v1171_v4 }
 0x612   :  { %v1084_v62 = vsel %vm1077_vm6, %v1080_v58, %v1083_v61  ;;  %1514 = vcosq.f32 %v1174_v45 }
 0x613   :  { %v1085_v20 = vsel %vm1074_vm7, nan, %v1084_v62  ;;  %1516 = vsinq.f32 %v1174_v45 }
 0x614   :  { %v1450_v11 = vpack.c.bf16 %v1085_v20, %v981_v44 }
 0x616   :  { %1451 = vmatpush3.bf16.msra.mxu0 %v1450_v11 }
 0x617   :  { %1429 = vmatprep.subr.mxu0 %v1542_v3  ;;  %v1190_v3 = vld [vmem:[%s2081_s4] sm:$0x1] }
 0x61c   :  { %v1515_v15 = vpop.eup %1514 }
 0x61d   :  { %v1517_v12 = vpop.eup %1516  ;;  %v1186_v21 = vxor.u32 2147483648, %v1515_v15 }
 0x61e   :  { %v1183_v22 = vxor.u32 2147483648, %v1517_v12 }
 0x61f   :  { %v1187_v8 = vsel %vm1185_vm10, %v1186_v21, %v1517_v12 }
 0x620   :  { %v1184_v0 = vsel %vm1182_vm11, %v1515_v15, %v1183_v22 }
 0x621   :  { %v1188_v19 = vsel %vm1181_vm12, %v1184_v0, %v1187_v8 }
 0x622   :  { %v1189_v23 = vsel %vm1178_vm13, nan, %v1188_v19 }
 0x623   :  { %1430 = vmatpush3.msk.msra.mxu0 %vm124_vm2, %v1189_v23 }
 0x624   :  { %1432 = vmatmul.mubr.msk.f32.vlgmr.msra.gmra.mrb[12].mxu0 %vm120_vm3, %v1190_v3 }
 0x6f7   :  { %v1273_v50 = vpop.f32.mrb[12].mxu0 }
 0x6f8   :  { %v1274_v25 = vadd.f32 %v1273_v50, %v1200_v24  ;;  %v1433_v14 = vpop.f32.mrb[13].mxu0 }
 0x6fa   :  { %1277 = vst [vmem:[#allocation3] sm:$0x1] %v1274_v25 }
 0x6fb   :  { %1529 = shalt.err (!%p1526_p4)
}
 0x6fc   :  { %s1530_s21 = scalar_lea.hbm %s2083_s6, 16 }
 0x6fd   :  { %p1531_p5 = scmp.ne.s32.totalorder %s2083_s6, %s1530_s21  ;;  %p1534_p6 = scmp.lt.u32.totalorder %s1530_s21, %s2083_s6 }
 0x6ff   :  { %p1536_p7 = pnand %p1534_p6, %p1531_p5 }
 0x701   :  { %1539 = shalt.err (!%p1536_p7)
}
 0x702   :  { %1287 = dma.vmem_to_hbm [thread:$0]  %s1285_s17, 16, %s2083_s6, [#allocation4]  }
 0x703   :  { %1540 = dma.done.wait [#allocation4], 16  }
 0x704   :  { %1541 = vsyncadd [#allocation4], 4294967280 }
 0x705   :  { %1291 = vsyncpa [#allocation4], 1 }

</bundles_post_ra>
